<compile_context>
chip_gen: v6e
topology: v6e:2x2x1
jax: 0.10.0
libtpu: 0.0.40
codegen_flags: <defaults>
</compile_context>

<pallas_src>
import math

import jax
import jax.numpy as jnp
from jax.experimental import pallas as pl
from jax.experimental.pallas import tpu as pltpu


# ----------------------------- model dims -----------------------------------
BATCH = 2
SEQ = 8
INPUT_SIZE = 16
EMBED_DIM = 32
NUM_HEADS = 4
HEAD_DIM = EMBED_DIM // NUM_HEADS
FF_HIDDEN = 64
OUTPUT_SIZE = 4
LN_EPS = 1e-5

BS = BATCH * SEQ            # 16 flattened rows
HBS = NUM_HEADS * BS        # 64 (heads stacked on the sublane axis)
PACK_LANES = 4 * EMBED_DIM  # 128

# ------------------- packed-weight layout (sublane rows) --------------------
# Each block starts at an 8-aligned row and at lane 0.
ROW_WCOMB = 0                        # (16, 128) fused [q | k | v | h] proj
ROW_WO    = ROW_WCOMB + INPUT_SIZE   # 16  (32, 32)
ROW_WF1   = ROW_WO + EMBED_DIM       # 48  (32, 64)
ROW_WF2   = ROW_WF1 + EMBED_DIM      # 80  (64, 32)
ROW_WFC   = ROW_WF2 + FF_HIDDEN      # 144 (32, 4)   LN2-affine folded in
ROW_MKV   = ROW_WFC + EMBED_DIM      # 176 (64, 64)  head block-diag mask for
                                     #               [k | v]; lanes 0:32 also
                                     #               serve as the denom mask
ROW_AMASK = ROW_MKV + HBS            # 240 (16, 64)  batch-local additive mask
ROW_POOL  = ROW_AMASK + BS           # 256 (2, 16)   per-batch mean-pool matrix
ROW_BIAS  = ROW_POOL + 8             # 264 bias rows (each at lane 0)
BR_BCOMB  = ROW_BIAS + 0             # (1, 128) fused bias
BR_BO     = ROW_BIAS + 1             # (1, 32)
BR_G1     = ROW_BIAS + 2             # (1, 32)
BR_BE1    = ROW_BIAS + 3             # (1, 32)
BR_BF1    = ROW_BIAS + 4             # (1, 64)
BR_BF2    = ROW_BIAS + 5             # (1, 32)
BR_BFC    = ROW_BIAS + 6             # (1, 4)   LN2-affine folded in
N_ROWS    = ROW_BIAS + 8             # 272 (multiple of 8)


# ------------------------------ Pallas kernel -------------------------------
def _transformer_ratio_kernel(x_ref, wp_ref, out_ref):
    E = EMBED_DIM

    # ---- fused input projection + QKV: (16,16) @ (16,128) = (16,128) -------
    # lane layout of `fused`: [q | k | v | h]; q already scaled by 1/sqrt(hd).
    w_comb = wp_ref[ROW_WCOMB:ROW_WCOMB + INPUT_SIZE, :]
    b_comb = wp_ref[BR_BCOMB:BR_BCOMB + 1, :]
    fused = jnp.dot(x_ref[...], w_comb,
                    preferred_element_type=jnp.float32) + b_comb   # (16,128)

    q = fused[:, 0:E]                  # lane 0 slice (free, on critical path)
    kv = fused[:, E:3 * E]             # (16,64) [k | v] slab (one extract)
    h = fused[:, 3 * E:4 * E]          # residual stream (off critical path)

    # ---- batched multi-head attention via block-diagonal masks -------------
    # One sublane replication + one mask multiply covers both k and v.
    mask_kv = wp_ref[ROW_MKV:ROW_MKV + HBS, 0:2 * E]               # (64,64)
    kvexp = jnp.concatenate([kv, kv, kv, kv], axis=0) * mask_kv    # (64,64)
    kexp = kvexp[:, 0:E]               # lane 0 slice (critical path)
    vexp = kvexp[:, E:2 * E]           # overlaps softmax chain

    # scores[row, h*BS + key_row] = <q_head_h(row), k_head_h(key_row)>
    s = jax.lax.dot_general(q, kexp, (((1,), (1,)), ((), ())),
                            preferred_element_type=jnp.float32)     # (16,64)
    s = s + wp_ref[ROW_AMASK:ROW_AMASK + BS, 0:HBS]  # keep attention batch-local
    s = s - jnp.max(s, axis=-1, keepdims=True)
    p = jnp.exp(s)                                                   # (16,64)

    # Two INDEPENDENT matmuls on the unnormalized p, then one (16,32) divide.
    # Masked columns of p are exactly 0 (exp(-1e30 - max) underflows), so the
    # per-head segmented softmax normalization is exact.
    attn_un = jnp.dot(p, vexp, preferred_element_type=jnp.float32)   # (16,32)
    denom = jnp.dot(p, wp_ref[ROW_MKV:ROW_MKV + HBS, 0:E],
                    preferred_element_type=jnp.float32)              # (16,32)
    attn = attn_un * pl.reciprocal(denom)   # exact (keeps 1e-5 tolerance)

    w_o = wp_ref[ROW_WO:ROW_WO + E, 0:E]
    b_o = wp_ref[BR_BO:BR_BO + 1, 0:E]
    attn_out = jnp.dot(attn, w_o, preferred_element_type=jnp.float32) + b_o

    # ---- residual + LayerNorm 1 (dropout = identity; one-pass moments) -----
    y = h + attn_out
    mu = jnp.mean(y, axis=-1, keepdims=True)
    msq = jnp.mean(y * y, axis=-1, keepdims=True)
    var = msq - mu * mu
    g1 = wp_ref[BR_G1:BR_G1 + 1, 0:E]
    be1 = wp_ref[BR_BE1:BR_BE1 + 1, 0:E]
    y = (y - mu) * jax.lax.rsqrt(var + LN_EPS) * g1 + be1

    # ---- feed-forward -------------------------------------------------------
    w_f1 = wp_ref[ROW_WF1:ROW_WF1 + E, 0:FF_HIDDEN]
    b_f1 = wp_ref[BR_BF1:BR_BF1 + 1, 0:FF_HIDDEN]
    f = jnp.maximum(jnp.dot(y, w_f1, preferred_element_type=jnp.float32)
                    + b_f1, 0.0)
    w_f2 = wp_ref[ROW_WF2:ROW_WF2 + FF_HIDDEN, 0:E]
    b_f2 = wp_ref[BR_BF2:BR_BF2 + 1, 0:E]
    f = jnp.dot(f, w_f2, preferred_element_type=jnp.float32) + b_f2

    # ---- residual + LayerNorm 2 (affine folded into fc; one-pass moments) ---
    z = y + f
    mu2 = jnp.mean(z, axis=-1, keepdims=True)
    msq2 = jnp.mean(z * z, axis=-1, keepdims=True)
    var2 = msq2 - mu2 * mu2
    zn = (z - mu2) * jax.lax.rsqrt(var2 + LN_EPS)

    # ---- per-batch mean pool (matmul), fc, softmax --------------------------
    pool = wp_ref[ROW_POOL:ROW_POOL + BATCH, 0:BS]                   # (2,16)
    pooled = jnp.dot(pool, zn, preferred_element_type=jnp.float32)   # (2,32)

    w_fc = wp_ref[ROW_WFC:ROW_WFC + E, 0:OUTPUT_SIZE]
    b_fc = wp_ref[BR_BFC:BR_BFC + 1, 0:OUTPUT_SIZE]
    logits = jnp.dot(pooled, w_fc, preferred_element_type=jnp.float32) + b_fc
    logits = logits - jnp.max(logits, axis=-1, keepdims=True)
    probs = jnp.exp(logits)
    out_ref[...] = probs * pl.reciprocal(
        jnp.sum(probs, axis=-1, keepdims=True))                      # (2,4)


# --------------------------- wrapper-side packing ----------------------------
def pack_params(p):
    """Fuse/fold parameters and pack everything into one (272, 128) array.

    Runs ONCE at model-build time (not per forward call).
    """
    scale = 1.0 / math.sqrt(HEAD_DIM)
    # fold 1/sqrt(head_dim) into the Q columns of the QKV projection
    sv = jnp.concatenate([jnp.full((EMBED_DIM,), scale, jnp.float32),
                          jnp.ones((2 * EMBED_DIM,), jnp.float32)])
    w_qkv_s = p["w_qkv"] * sv[None, :]
    b_qkv_s = p["b_qkv"] * sv[None, :]
    # fuse input_proj with QKV: fused lane layout is [q | k | v | h]
    w_comb = jnp.concatenate([p["w_in"] @ w_qkv_s, p["w_in"]], axis=1)   # (16,128)
    b_comb = jnp.concatenate([p["b_in"] @ w_qkv_s + b_qkv_s, p["b_in"]],
                             axis=1)                                      # (1,128)
    # fold the LayerNorm-2 affine (g2, be2) into the final fc
    w_fc_f = p["g2"].reshape(EMBED_DIM, 1) * p["w_fc"]                    # (32,4)
    b_fc_f = p["be2"] @ p["w_fc"] + p["b_fc"]                             # (1,4)

    # attention constants (block-diagonal masks) and mean-pool matrix
    eye_h = jnp.eye(NUM_HEADS, dtype=jnp.float32)
    mask_head = jnp.kron(eye_h, jnp.ones((BS, HEAD_DIM), jnp.float32))    # (64,32)
    mask_kv = jnp.concatenate([mask_head, mask_head], axis=1)             # (64,64)
    row_b = jnp.arange(BS) // SEQ
    col_b = (jnp.arange(HBS) % BS) // SEQ
    amask = jnp.where(row_b[:, None] == col_b[None, :],
                      0.0, -1e30).astype(jnp.float32)                     # (16,64)
    pool = jnp.kron(jnp.eye(BATCH, dtype=jnp.float32),
                    jnp.full((1, SEQ), 1.0 / SEQ, jnp.float32))           # (2,16)

    wp = jnp.zeros((N_ROWS, PACK_LANES), jnp.float32)

    def put(buf, row, arr):
        r, c = arr.shape
        return buf.at[row:row + r, 0:c].set(arr.astype(jnp.float32))

    wp = put(wp, ROW_WCOMB, w_comb)
    wp = put(wp, ROW_WO, p["w_o"])
    wp = put(wp, ROW_WF1, p["w_f1"])
    wp = put(wp, ROW_WF2, p["w_f2"])
    wp = put(wp, ROW_WFC, w_fc_f)
    wp = put(wp, ROW_MKV, mask_kv)
    wp = put(wp, ROW_AMASK, amask)
    wp = put(wp, ROW_POOL, pool)
    wp = put(wp, BR_BCOMB, b_comb)
    wp = put(wp, BR_BO, p["b_o"])
    wp = put(wp, BR_G1, p["g1"])
    wp = put(wp, BR_BE1, p["be1"])
    wp = put(wp, BR_BF1, p["b_f1"])
    wp = put(wp, BR_BF2, p["b_f2"])
    wp = put(wp, BR_BFC, b_fc_f)
    return wp


def make_transformer_ratio_predictor(params):
    """Builds the forward function.  Weight packing happens ONCE here."""
    wpack = jax.device_put(pack_params(params))   # device-resident constant

    call = pl.pallas_call(
        _transformer_ratio_kernel,
        out_shape=jax.ShapeDtypeStruct((BATCH, OUTPUT_SIZE), jnp.float32),
        in_specs=[
            pl.BlockSpec(memory_space=pltpu.MemorySpace.VMEM),   # x (16,16)
            pl.BlockSpec(memory_space=pltpu.MemorySpace.VMEM),   # packed weights
        ],
        out_specs=pl.BlockSpec(memory_space=pltpu.MemorySpace.VMEM),
    )

    @jax.jit
    def forward(x):
        x_flat = x.reshape(BATCH * SEQ, INPUT_SIZE).astype(jnp.float32)
        return call(x_flat, wpack)

    return forward


# ------------------------- deterministic params ------------------------------
def init_params(key):
    ks = jax.random.split(key, 16)
    scale = 0.1

    def W(k, shape):
        return scale * jax.random.normal(k, shape, dtype=jnp.float32)

    # PyTorch Linear weights are (out, in); store pre-transposed as (in, out).
    return {
        "w_in":  W(ks[0], (INPUT_SIZE, EMBED_DIM)),
        "b_in":  W(ks[1], (1, EMBED_DIM)),
        "w_qkv": W(ks[2], (EMBED_DIM, 3 * EMBED_DIM)),
        "b_qkv": W(ks[3], (1, 3 * EMBED_DIM)),
        "w_o":   W(ks[4], (EMBED_DIM, EMBED_DIM)),
        "b_o":   W(ks[5], (1, EMBED_DIM)),
        "g1":    jnp.ones((1, EMBED_DIM), jnp.float32),
        "be1":   jnp.zeros((1, EMBED_DIM), jnp.float32),
        "w_f1":  W(ks[6], (EMBED_DIM, FF_HIDDEN)),
        "b_f1":  W(ks[7], (1, FF_HIDDEN)),
        "w_f2":  W(ks[8], (FF_HIDDEN, EMBED_DIM)),
        "b_f2":  W(ks[9], (1, EMBED_DIM)),
        "g2":    jnp.ones((1, EMBED_DIM), jnp.float32),
        "be2":   jnp.zeros((1, EMBED_DIM), jnp.float32),
        "w_fc":  W(ks[10], (EMBED_DIM, OUTPUT_SIZE)),
        "b_fc":  W(ks[11], (1, OUTPUT_SIZE)),
    }


# --------------------------- pure-JAX reference -------------------------------
def reference_forward(x, p):
    def layernorm(y, g, b):
        mu = jnp.mean(y, axis=-1, keepdims=True)
        var = jnp.mean((y - mu) ** 2, axis=-1, keepdims=True)
        return (y - mu) * jax.lax.rsqrt(var + LN_EPS) * g + b

    h = x @ p["w_in"] + p["b_in"]                               # (B,S,E)
    qkv = h @ p["w_qkv"] + p["b_qkv"]                           # (B,S,3E)
    q, k, v = jnp.split(qkv, 3, axis=-1)
    B, S, E = h.shape

    def heads(t):
        return t.reshape(B, S, NUM_HEADS, HEAD_DIM).transpose(0, 2, 1, 3)

    qh, kh, vh = heads(q), heads(k), heads(v)
    s = jnp.einsum("bhqd,bhkd->bhqk", qh, kh) / math.sqrt(HEAD_DIM)
    pattn = jax.nn.softmax(s, axis=-1)
    a = jnp.einsum("bhqk,bhkd->bhqd", pattn, vh)
    a = a.transpose(0, 2, 1, 3).reshape(B, S, E)
    attn_out = a @ p["w_o"] + p["b_o"]

    y = layernorm(h + attn_out, p["g1"], p["be1"])
    f = jnp.maximum(y @ p["w_f1"] + p["b_f1"], 0.0) @ p["w_f2"] + p["b_f2"]
    z = layernorm(y + f, p["g2"], p["be2"])
    pooled = jnp.mean(z, axis=1)                                # (B,E)
    return jax.nn.softmax(pooled @ p["w_fc"] + p["b_fc"], axis=1)


# --------------------------------- main ---------------------------------------
if __name__ == "__main__":
    key = jax.random.PRNGKey(0)
    kx, kp = jax.random.split(key)
    x = jax.random.normal(kx, (BATCH, SEQ, INPUT_SIZE), dtype=jnp.float32)
    params = init_params(kp)

    forward = make_transformer_ratio_predictor(params)   # packs weights once
    out = jax.block_until_ready(forward(x))

    ref = jax.block_until_ready(reference_forward(x, params))
    assert out.shape == (BATCH, OUTPUT_SIZE)
    assert jnp.allclose(out, ref, atol=1e-5, rtol=1e-5), (out, ref)
    assert jnp.allclose(jnp.sum(out, axis=1), 1.0, atol=1e-5)

    print("KERNEL_OK")
</pallas_src>

<mosaic_0001>
module attributes {stable_mosaic.version = 11 : i64} {
  func.func @_transformer_ratio_kernel(%arg0: memref<16x16xf32, #tpu.memory_space<vmem>>, %arg1: memref<272x128xf32, #tpu.memory_space<vmem>>, %arg2: memref<2x4xf32, #tpu.memory_space<vmem>>) attributes {dimension_semantics = [], scalar_prefetch = 0 : i64, scratch_operands = 0 : i64, tpu.core_type = #tpu.core_type<tc>} {
    %c0 = arith.constant 0 : index
    %c0_0 = arith.constant 0 : index
    %0 = vector.load %arg1[%c0, %c0_0] : memref<272x128xf32, #tpu.memory_space<vmem>>, vector<16x128xf32>
    %c264 = arith.constant 264 : index
    %c0_1 = arith.constant 0 : index
    %1 = vector.load %arg1[%c264, %c0_1] : memref<272x128xf32, #tpu.memory_space<vmem>>, vector<1x128xf32>
    %c0_2 = arith.constant 0 : index
    %c0_3 = arith.constant 0 : index
    %2 = vector.load %arg0[%c0_2, %c0_3] : memref<16x16xf32, #tpu.memory_space<vmem>>, vector<16x16xf32>
    %cst = arith.constant dense<0.000000e+00> : vector<16x128xf32>
    %3 = tpu.matmul %2, %0, %cst {dimension_numbers = #tpu.dot_dimension_numbers<[1], [0], [0], [1], [0, 0, 1, 1], [], []>} : vector<16x16xf32>, vector<16x128xf32>, vector<16x128xf32> -> vector<16x128xf32>
    %4 = vector.broadcast %1 : vector<1x128xf32> to vector<16x128xf32>
    %5 = arith.addf %3, %4 : vector<16x128xf32>
    %6 = vector.extract_strided_slice %5 {offsets = [0, 0], sizes = [16, 32], strides = [1, 1]} : vector<16x128xf32> to vector<16x32xf32>
    %7 = vector.extract_strided_slice %5 {offsets = [0, 32], sizes = [16, 64], strides = [1, 1]} : vector<16x128xf32> to vector<16x64xf32>
    %8 = vector.extract_strided_slice %5 {offsets = [0, 96], sizes = [16, 32], strides = [1, 1]} : vector<16x128xf32> to vector<16x32xf32>
    %c176 = arith.constant 176 : index
    %c0_4 = arith.constant 0 : index
    %9 = vector.load %arg1[%c176, %c0_4] : memref<272x128xf32, #tpu.memory_space<vmem>>, vector<64x64xf32>
    %10 = tpu.concatenate %7, %7, %7, %7 in 0 : vector<16x64xf32>, vector<16x64xf32>, vector<16x64xf32>, vector<16x64xf32> -> vector<64x64xf32>
    %11 = arith.mulf %10, %9 : vector<64x64xf32>
    %12 = vector.extract_strided_slice %11 {offsets = [0, 0], sizes = [64, 32], strides = [1, 1]} : vector<64x64xf32> to vector<64x32xf32>
    %13 = vector.extract_strided_slice %11 {offsets = [0, 32], sizes = [64, 32], strides = [1, 1]} : vector<64x64xf32> to vector<64x32xf32>
    %cst_5 = arith.constant dense<0.000000e+00> : vector<16x64xf32>
    %14 = tpu.matmul %6, %12, %cst_5 {dimension_numbers = #tpu.dot_dimension_numbers<[1], [1], [0], [0], [0, 0, 1, 0], [], []>} : vector<16x32xf32>, vector<64x32xf32>, vector<16x64xf32> -> vector<16x64xf32>
    %c240 = arith.constant 240 : index
    %c0_6 = arith.constant 0 : index
    %15 = vector.load %arg1[%c240, %c0_6] : memref<272x128xf32, #tpu.memory_space<vmem>>, vector<16x64xf32>
    %16 = arith.addf %14, %15 : vector<16x64xf32>
    %cst_7 = arith.constant dense<0xFF800000> : vector<16xf32>
    %17 = vector.multi_reduction <maximumf>, %16, %cst_7 [1] : vector<16x64xf32> to vector<16xf32>
    %18 = vector.shape_cast %17 : vector<16xf32> to vector<16x1xf32>
    %19 = vector.broadcast %18 : vector<16x1xf32> to vector<16x64xf32>
    %20 = arith.subf %16, %19 : vector<16x64xf32>
    %21 = math.exp %20 : vector<16x64xf32>
    %cst_8 = arith.constant dense<0.000000e+00> : vector<16x32xf32>
    %22 = tpu.matmul %21, %13, %cst_8 {dimension_numbers = #tpu.dot_dimension_numbers<[1], [0], [0], [1], [0, 0, 1, 1], [], []>} : vector<16x64xf32>, vector<64x32xf32>, vector<16x32xf32> -> vector<16x32xf32>
    %c176_9 = arith.constant 176 : index
    %c0_10 = arith.constant 0 : index
    %23 = vector.load %arg1[%c176_9, %c0_10] : memref<272x128xf32, #tpu.memory_space<vmem>>, vector<64x32xf32>
    %cst_11 = arith.constant dense<0.000000e+00> : vector<16x32xf32>
    %24 = tpu.matmul %21, %23, %cst_11 {dimension_numbers = #tpu.dot_dimension_numbers<[1], [0], [0], [1], [0, 0, 1, 1], [], []>} : vector<16x64xf32>, vector<64x32xf32>, vector<16x32xf32> -> vector<16x32xf32>
    %25 = tpu.reciprocal %24 : vector<16x32xf32> -> vector<16x32xf32>
    %26 = arith.mulf %22, %25 : vector<16x32xf32>
    %c16 = arith.constant 16 : index
    %c0_12 = arith.constant 0 : index
    %27 = vector.load %arg1[%c16, %c0_12] : memref<272x128xf32, #tpu.memory_space<vmem>>, vector<32x32xf32>
    %c265 = arith.constant 265 : index
    %c0_13 = arith.constant 0 : index
    %28 = vector.load %arg1[%c265, %c0_13] : memref<272x128xf32, #tpu.memory_space<vmem>>, vector<1x32xf32>
    %cst_14 = arith.constant dense<0.000000e+00> : vector<16x32xf32>
    %29 = tpu.matmul %26, %27, %cst_14 {dimension_numbers = #tpu.dot_dimension_numbers<[1], [0], [0], [1], [0, 0, 1, 1], [], []>} : vector<16x32xf32>, vector<32x32xf32>, vector<16x32xf32> -> vector<16x32xf32>
    %30 = vector.broadcast %28 : vector<1x32xf32> to vector<16x32xf32>
    %31 = arith.addf %29, %30 : vector<16x32xf32>
    %32 = arith.addf %8, %31 : vector<16x32xf32>
    %cst_15 = arith.constant dense<0.000000e+00> : vector<16xf32>
    %33 = vector.multi_reduction <add>, %32, %cst_15 [1] : vector<16x32xf32> to vector<16xf32>
    %34 = vector.shape_cast %33 : vector<16xf32> to vector<16x1xf32>
    %cst_16 = arith.constant 3.200000e+01 : f32
    %35 = vector.broadcast %cst_16 : f32 to vector<16x1xf32>
    %36 = arith.divf %34, %35 : vector<16x1xf32>
    %37 = arith.mulf %32, %32 : vector<16x32xf32>
    %cst_17 = arith.constant dense<0.000000e+00> : vector<16xf32>
    %38 = vector.multi_reduction <add>, %37, %cst_17 [1] : vector<16x32xf32> to vector<16xf32>
    %39 = vector.shape_cast %38 : vector<16xf32> to vector<16x1xf32>
    %cst_18 = arith.constant 3.200000e+01 : f32
    %40 = vector.broadcast %cst_18 : f32 to vector<16x1xf32>
    %41 = arith.divf %39, %40 : vector<16x1xf32>
    %42 = arith.mulf %36, %36 : vector<16x1xf32>
    %43 = arith.subf %41, %42 : vector<16x1xf32>
    %c266 = arith.constant 266 : index
    %c0_19 = arith.constant 0 : index
    %44 = vector.load %arg1[%c266, %c0_19] : memref<272x128xf32, #tpu.memory_space<vmem>>, vector<1x32xf32>
    %c267 = arith.constant 267 : index
    %c0_20 = arith.constant 0 : index
    %45 = vector.load %arg1[%c267, %c0_20] : memref<272x128xf32, #tpu.memory_space<vmem>>, vector<1x32xf32>
    %46 = vector.broadcast %36 : vector<16x1xf32> to vector<16x32xf32>
    %47 = arith.subf %32, %46 : vector<16x32xf32>
    %cst_21 = arith.constant 9.99999974E-6 : f32
    %48 = vector.broadcast %cst_21 : f32 to vector<16x1xf32>
    %49 = arith.addf %43, %48 : vector<16x1xf32>
    %50 = math.rsqrt %49 : vector<16x1xf32>
    %51 = vector.broadcast %50 : vector<16x1xf32> to vector<16x32xf32>
    %52 = arith.mulf %47, %51 : vector<16x32xf32>
    %53 = vector.broadcast %44 : vector<1x32xf32> to vector<16x32xf32>
    %54 = arith.mulf %52, %53 : vector<16x32xf32>
    %55 = vector.broadcast %45 : vector<1x32xf32> to vector<16x32xf32>
    %56 = arith.addf %54, %55 : vector<16x32xf32>
    %c48 = arith.constant 48 : index
    %c0_22 = arith.constant 0 : index
    %57 = vector.load %arg1[%c48, %c0_22] : memref<272x128xf32, #tpu.memory_space<vmem>>, vector<32x64xf32>
    %c268 = arith.constant 268 : index
    %c0_23 = arith.constant 0 : index
    %58 = vector.load %arg1[%c268, %c0_23] : memref<272x128xf32, #tpu.memory_space<vmem>>, vector<1x64xf32>
    %cst_24 = arith.constant dense<0.000000e+00> : vector<16x64xf32>
    %59 = tpu.matmul %56, %57, %cst_24 {dimension_numbers = #tpu.dot_dimension_numbers<[1], [0], [0], [1], [0, 0, 1, 1], [], []>} : vector<16x32xf32>, vector<32x64xf32>, vector<16x64xf32> -> vector<16x64xf32>
    %60 = vector.broadcast %58 : vector<1x64xf32> to vector<16x64xf32>
    %61 = arith.addf %59, %60 : vector<16x64xf32>
    %cst_25 = arith.constant 0.000000e+00 : f32
    %62 = vector.broadcast %cst_25 : f32 to vector<16x64xf32>
    %63 = arith.maximumf %61, %62 : vector<16x64xf32>
    %c80 = arith.constant 80 : index
    %c0_26 = arith.constant 0 : index
    %64 = vector.load %arg1[%c80, %c0_26] : memref<272x128xf32, #tpu.memory_space<vmem>>, vector<64x32xf32>
    %c269 = arith.constant 269 : index
    %c0_27 = arith.constant 0 : index
    %65 = vector.load %arg1[%c269, %c0_27] : memref<272x128xf32, #tpu.memory_space<vmem>>, vector<1x32xf32>
    %cst_28 = arith.constant dense<0.000000e+00> : vector<16x32xf32>
    %66 = tpu.matmul %63, %64, %cst_28 {dimension_numbers = #tpu.dot_dimension_numbers<[1], [0], [0], [1], [0, 0, 1, 1], [], []>} : vector<16x64xf32>, vector<64x32xf32>, vector<16x32xf32> -> vector<16x32xf32>
    %67 = vector.broadcast %65 : vector<1x32xf32> to vector<16x32xf32>
    %68 = arith.addf %66, %67 : vector<16x32xf32>
    %69 = arith.addf %56, %68 : vector<16x32xf32>
    %cst_29 = arith.constant dense<0.000000e+00> : vector<16xf32>
    %70 = vector.multi_reduction <add>, %69, %cst_29 [1] : vector<16x32xf32> to vector<16xf32>
    %71 = vector.shape_cast %70 : vector<16xf32> to vector<16x1xf32>
    %cst_30 = arith.constant 3.200000e+01 : f32
    %72 = vector.broadcast %cst_30 : f32 to vector<16x1xf32>
    %73 = arith.divf %71, %72 : vector<16x1xf32>
    %74 = arith.mulf %69, %69 : vector<16x32xf32>
    %cst_31 = arith.constant dense<0.000000e+00> : vector<16xf32>
    %75 = vector.multi_reduction <add>, %74, %cst_31 [1] : vector<16x32xf32> to vector<16xf32>
    %76 = vector.shape_cast %75 : vector<16xf32> to vector<16x1xf32>
    %cst_32 = arith.constant 3.200000e+01 : f32
    %77 = vector.broadcast %cst_32 : f32 to vector<16x1xf32>
    %78 = arith.divf %76, %77 : vector<16x1xf32>
    %79 = arith.mulf %73, %73 : vector<16x1xf32>
    %80 = arith.subf %78, %79 : vector<16x1xf32>
    %81 = vector.broadcast %73 : vector<16x1xf32> to vector<16x32xf32>
    %82 = arith.subf %69, %81 : vector<16x32xf32>
    %cst_33 = arith.constant 9.99999974E-6 : f32
    %83 = vector.broadcast %cst_33 : f32 to vector<16x1xf32>
    %84 = arith.addf %80, %83 : vector<16x1xf32>
    %85 = math.rsqrt %84 : vector<16x1xf32>
    %86 = vector.broadcast %85 : vector<16x1xf32> to vector<16x32xf32>
    %87 = arith.mulf %82, %86 : vector<16x32xf32>
    %c256 = arith.constant 256 : index
    %c0_34 = arith.constant 0 : index
    %88 = vector.load %arg1[%c256, %c0_34] : memref<272x128xf32, #tpu.memory_space<vmem>>, vector<2x16xf32>
    %cst_35 = arith.constant dense<0.000000e+00> : vector<2x32xf32>
    %89 = tpu.matmul %88, %87, %cst_35 {dimension_numbers = #tpu.dot_dimension_numbers<[1], [0], [0], [1], [0, 0, 1, 1], [], []>} : vector<2x16xf32>, vector<16x32xf32>, vector<2x32xf32> -> vector<2x32xf32>
    %c144 = arith.constant 144 : index
    %c0_36 = arith.constant 0 : index
    %90 = vector.load %arg1[%c144, %c0_36] : memref<272x128xf32, #tpu.memory_space<vmem>>, vector<32x4xf32>
    %c270 = arith.constant 270 : index
    %c0_37 = arith.constant 0 : index
    %91 = vector.load %arg1[%c270, %c0_37] : memref<272x128xf32, #tpu.memory_space<vmem>>, vector<1x4xf32>
    %cst_38 = arith.constant dense<0.000000e+00> : vector<2x4xf32>
    %92 = tpu.matmul %89, %90, %cst_38 {dimension_numbers = #tpu.dot_dimension_numbers<[1], [0], [0], [1], [0, 0, 1, 1], [], []>} : vector<2x32xf32>, vector<32x4xf32>, vector<2x4xf32> -> vector<2x4xf32>
    %93 = vector.broadcast %91 : vector<1x4xf32> to vector<2x4xf32>
    %94 = arith.addf %92, %93 : vector<2x4xf32>
    %cst_39 = arith.constant dense<0xFF800000> : vector<2xf32>
    %95 = vector.multi_reduction <maximumf>, %94, %cst_39 [1] : vector<2x4xf32> to vector<2xf32>
    %96 = vector.shape_cast %95 : vector<2xf32> to vector<2x1xf32>
    %97 = vector.broadcast %96 : vector<2x1xf32> to vector<2x4xf32>
    %98 = arith.subf %94, %97 : vector<2x4xf32>
    %99 = math.exp %98 : vector<2x4xf32>
    %cst_40 = arith.constant dense<0.000000e+00> : vector<2xf32>
    %100 = vector.multi_reduction <add>, %99, %cst_40 [1] : vector<2x4xf32> to vector<2xf32>
    %101 = vector.shape_cast %100 : vector<2xf32> to vector<2x1xf32>
    %102 = tpu.reciprocal %101 : vector<2x1xf32> -> vector<2x1xf32>
    %103 = vector.broadcast %102 : vector<2x1xf32> to vector<2x4xf32>
    %104 = arith.mulf %99, %103 : vector<2x4xf32>
    %c0_41 = arith.constant 0 : index
    %c0_42 = arith.constant 0 : index
    %105 = vector.load %arg2[%c0_41, %c0_42] : memref<2x4xf32, #tpu.memory_space<vmem>>, vector<2x4xf32>
    tpu.vector_store %arg2[%c0_41, %c0_42], %104 {strides = array<i32>} : memref<2x4xf32, #tpu.memory_space<vmem>>, vector<2x4xf32>,
    return
  }
}

</mosaic_0001>

<bundles_post_ra>
// kernel: forward.1
= control target key start
LH: loop header
LB: loop body
LE: loop exit
PB: predicated region body
PF: predicated region fallthrough
CT: control target
= control target key end

     0   :  { %7 = vsyncpa [#allocation3], 0  ;;  %s1615_s0 = inlined_call_operand.hbm [shape: f32[16,16], index: 0, kind: input, shape index: {}]   ;;  %s1616_s1 = inlined_call_operand.hbm [shape: f32[272,128], index: 1, kind: input, shape index: {}]   ;;  %s1617_s2 = inlined_call_operand.hbm [shape: f32[2,4], index: 2, kind: output, shape index: {}]  }
   0x1   :  { %8 = vsyncpa [#allocation6], 0 }
   0x2   :  { %9 = vsyncpa [#allocation4], 0  ;;  %s1422_s9 = smov [#allocation2]  }
   0x3   :  { %s15_s10 = sshll.u32 %s1422_s9, 4  ;;  %s16_s10 = int_to_ptr.vmem [resolvable:$true] %s15_s10 }
   0x4   :  { %s1364_s11 = scalar_lea.vmem %s16_s10, 256  ;;  %p1369_p1 = scmp.lt.s32.totalorder %s16_s10, %s16_s10 }
   0x5   :  { %p1365_p0 = scmp.ne.s32.totalorder %s16_s10, %s1364_s11  ;;  %p1370_p2 = scmp.lt.s32.totalorder %s1364_s11, %s1364_s11 }
   0x7   :  { %p1371_p3 = por %p1370_p2, %p1369_p1 }
   0x9   :  { %p1372_p4 = pnand %p1371_p3, %p1365_p0 }
   0xb   :  { %1375 = shalt.err (!%p1372_p4)
}
   0xc   :  { %s1423_s12 = smov 128   ;;  %s1424_s13 = smov 8  }
   0xd   :  { %21 = dma.hbm_to_vmem [thread:$0]  %s1615_s0, 256, %s16_s10, [#allocation3], %s1423_s12, %s1423_s12, %s1424_s13  }
   0xe   :  { %s1425_s16 = smov [#allocation5]  }
   0xf   :  { %s27_s17 = sshll.u32 %s1425_s16, 4  ;;  %s28_s17 = int_to_ptr.vmem [resolvable:$true] %s27_s17 }
  0x10   :  { %s1384_s18 = scalar_lea.vmem %s28_s17, 4352  ;;  %p1389_p6 = scmp.lt.s32.totalorder %s28_s17, %s28_s17 }
  0x11   :  { %p1385_p5 = scmp.ne.s32.totalorder %s28_s17, %s1384_s18  ;;  %p1390_p7 = scmp.lt.s32.totalorder %s1384_s18, %s1384_s18 }
  0x13   :  { %p1391_p8 = por %p1390_p7, %p1389_p6 }
  0x15   :  { %p1392_p9 = pnand %p1391_p8, %p1385_p5 }
  0x17   :  { %1395 = shalt.err (!%p1392_p9)
}
  0x18   :  { %33 = dma.hbm_to_vmem [thread:$0]  %s1616_s1, 4352, %s28_s17, [#allocation6], %s1423_s12, %s1423_s12, %s1424_s13  }
  0x19   :  { %1416 = dma.done.wait [#allocation3], 256  }
  0x1a   :  { %1417 = vsyncadd [#allocation3], 4294967040 }
  0x1b   :  { %1418 = dma.done.wait [#allocation6], 4352  }
  0x1c   :  { %1419 = vsyncadd [#allocation6], 4294962944  ;;  %vm49_vm0 = vcmask 130048   ;;  %v41_v0 = vld [vmem:[#allocation5 + $0x8] sm:$0xff]  ;;  %v40_v1 = vld [vmem:[#allocation5] sm:$0xff]  ;;  %s1426_s0 = smov 32  }
  0x1d   :  { %v43_v2 = vld [vmem:[#allocation2] sm:$0xff]  ;;  %1203 = vmatprep.subr.mxu0 %v41_v0  ;;  %v1454_v3 = vld [vmem:[#allocation5 + $0xe8] sm:$0xff]  ;;  %v1456_v4 = vld [vmem:[#allocation5 + $0xd8] sm:$0xff]  ;;  %vm205_vm1 = vcmask 261120   ;;  %s1427_s1 = smov 96   ;;  %s1428_s21 = smov 64  }
  0x1e   :  { %1207 = vmatprep.mubr.msk.f32.mxu0 %vm49_vm0, %v43_v2  ;;  %1204 = vmatpush3.msra.mxu0 %v41_v0  ;;  %v44_v5 = vld [vmem:[#allocation2 + $0x8] sm:$0xff]  ;;  %v1462_v6 = vld [vmem:[#allocation5 + $0xe0] sm:$0xff]  ;;  %v1464_v7 = vld [vmem:[#allocation5 + $0xd0] sm:$0xff]  ;;  %vm303_vm2 = vcmask 523264   ;;  %vm1430_vm3 = vmmov 0   ;;  %vm1079_vm4 = vcmask 25600  }
  0x1f   :  { %161 = vrot.lane.b32.xlu0 %v1454_v3, %s1426_s0  ;;  %1205 = vmatprep.subr.mxu0 %v40_v1  ;;  %v1471_v8 = vld [vmem:[#allocation5 + $0xc8] sm:$0xff]  ;;  %v1473_v9 = vld [vmem:[#allocation5 + $0xc0] sm:$0xff]  ;;  %v1479_v10 = vld [vmem:[#allocation5 + $0xb8] sm:$0xff]  ;;  %s1431_s22 = smov [#allocation7]  }
  0x20   :  { %157 = vrot.lane.b32.xlu1 %v1456_v4, %s1426_s0  ;;  %1206 = vmatpush3.msra.mxu0 %v40_v1  ;;  %v1481_v11 = vld [vmem:[#allocation5 + $0xb0] sm:$0xff]  ;;  %v1108_v14 = vld [vmem:[#allocation5 + $0x108] ss:$0 sm:$0xff]  ;;  %v180_v47 = vld [vmem:[#allocation5 + $0xf8] sm:$0xff]  ;;  %s1098_s23 = sshll.u32 %s1431_s22, 4  ;;  %s1099_s23 = int_to_ptr.vmem [resolvable:$true] %s1098_s23 }
  0x21   :  { %1208 = vmatmul.mubr.msk.f32.vlgmr.msra.gmra.mxu0 %vm49_vm0, %v44_v5  ;;  %v179_v49 = vld [vmem:[#allocation5 + $0xf0] sm:$0xff]  ;;  %v503_v1 = vld [vmem:[#allocation5 + $0x28] sm:$0xff]  ;;  %v502_v2 = vld [vmem:[#allocation5 + $0x20] sm:$0xff]  ;;  %s1396_s24 = scalar_lea.vmem %s1099_s23, 32  ;;  %p1401_p11 = scmp.lt.s32.totalorder %s1099_s23, %s1099_s23 }
  0x22   :  { %p1397_p10 = scmp.ne.s32.totalorder %s1099_s23, %s1396_s24  ;;  %p1402_p12 = scmp.lt.s32.totalorder %s1396_s24, %s1396_s24 }
  0x23   :  { %159 = vrot.lane.b32.xlu0 %v1462_v6, %s1426_s0 }
  0x24   :  { %155 = vrot.lane.b32.xlu1 %v1464_v7, %s1426_s0  ;;  %p1403_p13 = por %p1402_p12, %p1401_p11 }
  0x26   :  { %p1404_p0 = pnand %p1403_p13, %p1397_p10 }
  0x27   :  { %153 = vrot.lane.b32.xlu0 %v1471_v8, %s1426_s0 }
  0x28   :  { %151 = vrot.lane.b32.xlu1 %v1473_v9, %s1426_s0 }
  0x2b   :  { %149 = vrot.lane.b32.xlu0 %v1479_v10, %s1426_s0 }
  0x2c   :  { %147 = vrot.lane.b32.xlu1 %v1481_v11, %s1426_s0 }
  0x91   :  { %v162_v12 = vpop.permute.xlu0 %161 }
  0x92   :  { %v158_v13 = vpop.permute.xlu1 %157 }
  0x95   :  { %v160_v15 = vpop.permute.xlu0 %159 }
  0x96   :  { %v156_v18 = vpop.permute.xlu1 %155 }
  0x99   :  { %v154_v23 = vpop.permute.xlu0 %153 }
  0x9a   :  { %v152_v25 = vpop.permute.xlu1 %151 }
  0x9d   :  { %v150_v28 = vpop.permute.xlu0 %149 }
  0x9e   :  { %v148_v30 = vpop.permute.xlu1 %147 }
  0xe1   :  { %v1209_v16 = vpop.f32.mrf.mxu0 }
  0xe2   :  { %v1487_v17 = vadd.f32 %v1209_v16, %v1108_v14 }
  0xe3   :  { %v122_v19 = vpop.f32.mrf.mxu0 }
  0xe4   :  { %v1489_v20 = vadd.f32 %v1108_v14, %v122_v19  ;;  %v178_v21 = vmul.f32 %v162_v12, %v1487_v17  ;;  %v176_v24 = vmul.f32 %v158_v13, %v1487_v17  ;;  %v174_v27 = vmul.f32 %v154_v23, %v1487_v17  ;;  %v1125_v13 = vld [vmem:[#allocation5 + $0x109] ss:$0 sm:$0xff] }
  0xe5   :  { %v1505_v31 = vmul.f32 %v150_v28, %v1487_v17 }
  0xe6   :  { %203 = vrot.lane.b32.xlu0 %v178_v21, %s1427_s1  ;;  %1226 = vmatprep.mubr.msk.f32.mxu1 %vm205_vm1, %v1489_v20  ;;  %v177_v22 = vmul.f32 %v160_v15, %v1489_v20  ;;  %v175_v26 = vmul.f32 %v156_v18, %v1489_v20  ;;  %v173_v29 = vmul.f32 %v152_v25, %v1489_v20 }
  0xe7   :  { %v1509_v32 = vmul.f32 %v148_v30, %v1489_v20 }
  0xe8   :  { %201 = vrot.lane.b32.xlu1 %v177_v22, %s1427_s1 }
  0xea   :  { %199 = vrot.lane.b32.xlu0 %v176_v24, %s1427_s1 }
  0xec   :  { %197 = vrot.lane.b32.xlu1 %v175_v26, %s1427_s1 }
  0xee   :  { %195 = vrot.lane.b32.xlu0 %v174_v27, %s1427_s1 }
  0xf0   :  { %193 = vrot.lane.b32.xlu1 %v173_v29, %s1427_s1 }
  0xf2   :  { %191 = vrot.lane.b32.xlu0 %v1505_v31, %s1427_s1 }
  0xf4   :  { %189 = vrot.lane.b32.xlu1 %v1509_v32, %s1427_s1 }
  0xf6   :  { %330 = vrot.lane.b32.xlu0 %v178_v21, %s1428_s21 }
  0xf8   :  { %328 = vrot.lane.b32.xlu1 %v177_v22, %s1428_s21 }
  0xfa   :  { %326 = vrot.lane.b32.xlu0 %v176_v24, %s1428_s21 }
  0xfc   :  { %324 = vrot.lane.b32.xlu1 %v175_v26, %s1428_s21 }
  0xfe   :  { %322 = vrot.lane.b32.xlu0 %v174_v27, %s1428_s21 }
 0x100   :  { %320 = vrot.lane.b32.xlu1 %v173_v29, %s1428_s21 }
 0x158   :  { %v204_v33 = vpop.permute.xlu0 %203 }
 0x159   :  { %1210 = vmatprep.subr.msk.mxu1 %vm205_vm1, %v204_v33 }
 0x15a   :  { %1211 = vmatpush3.xpose.msk.msra.mxu1 %vm205_vm1, %v204_v33  ;;  %v202_v34 = vpop.permute.xlu1 %201  ;;  %v1129_v33 = vld [vmem:[#allocation5 + $0x10b] ss:$0 sm:$0xff] }
 0x15b   :  { %1212 = vmatprep.subr.msk.mxu1 %vm205_vm1, %v202_v34 }
 0x15c   :  { %v200_v35 = vpop.permute.xlu0 %199 }
 0x15e   :  { %1213 = vmatpush3.xpose.msk.msra.mxu1 %vm205_vm1, %v202_v34  ;;  %v198_v36 = vpop.permute.xlu1 %197  ;;  %v672_v34 = vld [vmem:[#allocation5 + $0x48] sm:$0xff] }
 0x15f   :  { %1214 = vmatprep.subr.msk.mxu1 %vm205_vm1, %v200_v35 }
 0x160   :  { %v196_v37 = vpop.permute.xlu0 %195 }
 0x162   :  { %1215 = vmatpush3.xpose.msk.msra.mxu1 %vm205_vm1, %v200_v35  ;;  %v194_v38 = vpop.permute.xlu1 %193  ;;  %v671_v35 = vld [vmem:[#allocation5 + $0x40] sm:$0xff] }
 0x163   :  { %1216 = vmatprep.subr.msk.mxu1 %vm205_vm1, %v198_v36 }
 0x164   :  { %v192_v39 = vpop.permute.xlu0 %191 }
 0x166   :  { %1217 = vmatpush3.xpose.msk.msra.mxu1 %vm205_vm1, %v198_v36  ;;  %v190_v40 = vpop.permute.xlu1 %189 }
 0x167   :  { %1218 = vmatprep.subr.msk.mxu1 %vm205_vm1, %v196_v37 }
 0x168   :  { %v331_v41 = vpop.permute.xlu0 %330 }
 0x169   :  { %1229 = vmatprep.subr.mxu0 %v331_v41 }
 0x16a   :  { %1219 = vmatpush3.xpose.msk.msra.mxu1 %vm205_vm1, %v196_v37  ;;  %1230 = vmatpush3.msra.mxu0 %v331_v41  ;;  %v329_v42 = vpop.permute.xlu1 %328 }
 0x16b   :  { %1220 = vmatprep.subr.msk.mxu1 %vm205_vm1, %v194_v38  ;;  %1231 = vmatprep.subr.mxu0 %v329_v42 }
 0x16c   :  { %v327_v43 = vpop.permute.xlu0 %326  ;;  %1232 = vmatpush3.msra.mxu0 %v329_v42 }
 0x16d   :  { %1233 = vmatprep.subr.mxu0 %v327_v43 }
 0x16e   :  { %1221 = vmatpush3.xpose.msk.msra.mxu1 %vm205_vm1, %v194_v38  ;;  %1234 = vmatpush3.msra.mxu0 %v327_v43  ;;  %v325_v44 = vpop.permute.xlu1 %324 }
 0x16f   :  { %1222 = vmatprep.subr.msk.mxu1 %vm205_vm1, %v192_v39  ;;  %1235 = vmatprep.subr.mxu0 %v325_v44 }
 0x170   :  { %v323_v45 = vpop.permute.xlu0 %322  ;;  %1236 = vmatpush3.msra.mxu0 %v325_v44 }
 0x171   :  { %1237 = vmatprep.subr.mxu0 %v323_v45 }
 0x172   :  { %1223 = vmatpush3.xpose.msk.msra.mxu1 %vm205_vm1, %v192_v39  ;;  %1238 = vmatpush3.msra.mxu0 %v323_v45  ;;  %v321_v46 = vpop.permute.xlu1 %320 }
 0x173   :  { %1224 = vmatprep.subr.msk.mxu1 %vm205_vm1, %v190_v40  ;;  %1239 = vmatprep.subr.mxu0 %v321_v46 }
 0x174   :  { %1240 = vmatpush3.msra.mxu0 %v321_v46 }
 0x176   :  { %1225 = vmatpush3.xpose.msk.msra.mxu1 %vm205_vm1, %v190_v40 }
 0x177   :  { %1267 = vmatprep.subr.mxu1 %v503_v1 }
 0x179   :  { %1227 = vmatmul.mubr.msk.f32.vlgmr.msra.gmra.mxu1 %vm205_vm1, %v1487_v17 }
 0x17a   :  { %1268 = vmatpush3.msra.mxu1 %v503_v1 }
 0x17b   :  { %1269 = vmatprep.subr.mxu1 %v502_v2 }
 0x17c   :  { %1270 = vmatpush3.msra.mxu1 %v502_v2 }
 0x239   :  { %v1228_v48 = vpop.f32.mrf.mxu1 }
 0x23a   :  { %v300_v50 = vadd.f32 %v1228_v48, %v180_v47 }
 0x23b   :  { %v294_v51 = vpop.f32.mrf.mxu1 }
 0x23c   :  { %v295_v52 = vadd.f32 %v294_v51, %v179_v49  ;;  %v307_v53 = vsel %vm303_vm2, %v300_v50, -inf  ;;  %v669_v51 = vld [vmem:[#allocation5 + $0x30] sm:$0xff] }
 0x23d   :  { %308 = vmax.xlane.f32.xlu1 %v307_v53  ;;  %v771_v53 = vld [vmem:[#allocation5 + $0x80] sm:$0xff] }
 0x23e   :  { %v304_v54 = vsel %vm303_vm2, %v295_v52, -inf }
 0x23f   :  { %305 = vmax.xlane.f32.xlu0 %v304_v54 }
 0x24e   :  { %316 = vrot.lane.b32.xlu1 %v1509_v32, %s1428_s21  ;;  %v1128_v32 = vld [vmem:[#allocation5 + $0x10a] ss:$0 sm:$0xff] }
 0x255   :  { %318 = vrot.lane.b32.xlu0 %v1505_v31, %s1428_s21 }
 0x2c6   :  { %v309_v55 = vpop.xlane.xlu1 %308 }
 0x2c7   :  { %v311_v56 = vsub.f32 %v300_v50, %v309_v55  ;;  %v670_v50 = vld [vmem:[#allocation5 + $0x38] sm:$0xff] }
 0x2c8   :  { %v306_v57 = vpop.xlane.xlu0 %305 }
 0x2c9   :  { %v310_v58 = vsub.f32 %v295_v52, %v306_v57  ;;  %v314_v59 = vmul.f32 1.442695, %v311_v56  ;;  %v772_v52 = vld [vmem:[#allocation5 + $0x88] sm:$0xff]  ;;  %v770_v57 = vld [vmem:[#allocation5 + $0x78] sm:$0xff] }
 0x2ca   :  { %v317_v62 = vpop.permute.xlu1 %316 }
 0x2cb   :  { %v312_v60 = vmul.f32 1.442695, %v310_v58 }
 0x2cc   :  { %v319_v61 = vpop.permute.xlu0 %318 }
 0x2cd   :  { %1336 = vpow2.f32 %v312_v60  ;;  %1241 = vmatprep.subr.mxu0 %v319_v61  ;;  %v769_v60 = vld [vmem:[#allocation5 + $0x70] sm:$0xff] }
 0x2ce   :  { %1338 = vpow2.f32 %v314_v59  ;;  %1242 = vmatpush3.msra.mxu0 %v319_v61 }
 0x2cf   :  { %1243 = vmatprep.subr.mxu0 %v317_v62 }
 0x2d0   :  { %1244 = vmatpush3.msra.mxu0 %v317_v62 }
 0x2d1   :  { %1248 = vmatprep.subr.mxu0 %v1454_v3 }
 0x2da   :  { %v1337_v63 = vpop.eup %1336 }
 0x2db   :  { %v1339_v0 = vpop.eup %1338  ;;  %1245 = vmatprep.mubr.msk.f32.mxu0 %vm303_vm2, %v1337_v63 }
 0x2dc   :  { %1246 = vmatmul.mubr.msk.f32.vlgmr.msra.gmra.mxu0 %vm303_vm2, %v1339_v0 }
 0x2dd   :  { %1249 = vmatpush3.msra.mxu0 %v1454_v3  ;;  %1264 = vmatprep.mubr.msk.f32.mxu0 %vm303_vm2, %v1337_v63  ;;  %v501_v3 = vld [vmem:[#allocation5 + $0x18] sm:$0xff] }
 0x2de   :  { %1250 = vmatprep.subr.mxu0 %v1462_v6  ;;  %1271 = vmatprep.subr.mxu1 %v501_v3 }
 0x2df   :  { %1251 = vmatpush3.msra.mxu0 %v1462_v6  ;;  %1272 = vmatpush3.msra.mxu1 %v501_v3 }
 0x2e0   :  { %1252 = vmatprep.subr.mxu0 %v1456_v4 }
 0x2e1   :  { %1253 = vmatpush3.msra.mxu0 %v1456_v4  ;;  %v500_v4 = vld [vmem:[#allocation5 + $0x10] sm:$0xff] }
 0x2e2   :  { %1254 = vmatprep.subr.mxu0 %v1464_v7  ;;  %1273 = vmatprep.subr.mxu1 %v500_v4 }
 0x2e3   :  { %1255 = vmatpush3.msra.mxu0 %v1464_v7  ;;  %1274 = vmatpush3.msra.mxu1 %v500_v4 }
 0x2e4   :  { %1256 = vmatprep.subr.mxu0 %v1471_v8  ;;  %1289 = vmatprep.subr.mxu1 %v772_v52 }
 0x2e5   :  { %1257 = vmatpush3.msra.mxu0 %v1471_v8 }
 0x2e6   :  { %1258 = vmatprep.subr.mxu0 %v1473_v9 }
 0x2e7   :  { %1259 = vmatpush3.msra.mxu0 %v1473_v9 }
 0x2e8   :  { %1260 = vmatprep.subr.mxu0 %v1479_v10 }
 0x2e9   :  { %1261 = vmatpush3.msra.mxu0 %v1479_v10 }
 0x2ea   :  { %1262 = vmatprep.subr.mxu0 %v1481_v11 }
 0x2eb   :  { %1263 = vmatpush3.msra.mxu0 %v1481_v11 }
 0x2ec   :  { %1265 = vmatmul.mubr.msk.f32.vlgmr.msra.gmra.mxu0 %vm303_vm2, %v1339_v0  ;;  %1278 = vmatprep.subr.mxu0 %v672_v34 }
 0x2ed   :  { %1279 = vmatpush3.msra.mxu0 %v672_v34 }
 0x2ee   :  { %1280 = vmatprep.subr.mxu0 %v671_v35 }
 0x2ef   :  { %1281 = vmatpush3.msra.mxu0 %v671_v35 }
 0x2f0   :  { %1282 = vmatprep.subr.mxu0 %v670_v50 }
 0x2f1   :  { %1283 = vmatpush3.msra.mxu0 %v670_v50 }
 0x2f2   :  { %1284 = vmatprep.subr.mxu0 %v669_v51 }
 0x2f3   :  { %1285 = vmatpush3.msra.mxu0 %v669_v51 }
 0x39c   :  { %v1247_v5 = vpop.f32.mrf.mxu0 }
 0x39e   :  { %v412_v6 = vpop.f32.mrf.mxu0 }
 0x3ac   :  { %v1266_v7 = vpop.f32.mrf.mxu0 }
 0x3ad   :  { %1340 = vrcp.f32 %v1266_v7  ;;  %v767_v7 = vld [vmem:[#allocation5 + $0x60] sm:$0xff] }
 0x3ae   :  { %v487_v8 = vpop.f32.mrf.mxu0 }
 0x3af   :  { %1342 = vrcp.f32 %v487_v8  ;;  %v766_v8 = vld [vmem:[#allocation5 + $0x58] sm:$0xff] }
 0x3ba   :  { %v1341_v9 = vpop.eup %1340 }
 0x3bb   :  { %v499_v12 = vmul.f32 %v1341_v9, %v1247_v5  ;;  %v765_v9 = vld [vmem:[#allocation5 + $0x50] sm:$0xff] }
 0x3bc   :  { %v1343_v10 = vpop.eup %1342 }
 0x3bd   :  { %v498_v11 = vmul.f32 %v1343_v10, %v412_v6  ;;  %v768_v6 = vld [vmem:[#allocation5 + $0x68] sm:$0xff] }
 0x3be   :  { %v1130_v10 = vld [vmem:[#allocation5 + $0x10c] ss:$0 sm:$0xff] }
 0x3bf   :  { %1275 = vmatprep.mubr.msk.f32.mxu1 %vm205_vm1, %v498_v11 }
 0x3c0   :  { %1276 = vmatmul.mubr.msk.f32.vlgmr.msra.gmra.mxu1 %vm205_vm1, %v499_v12 }
 0x3c1   :  { %1290 = vmatpush3.msra.mxu1 %v772_v52 }
 0x3c2   :  { %1291 = vmatprep.subr.mxu1 %v771_v53 }
 0x3c3   :  { %1292 = vmatpush3.msra.mxu1 %v771_v53 }
 0x3c4   :  { %1293 = vmatprep.subr.mxu1 %v770_v57 }
 0x3c5   :  { %1294 = vmatpush3.msra.mxu1 %v770_v57 }
 0x3c6   :  { %1295 = vmatprep.subr.mxu1 %v769_v60 }
 0x3c7   :  { %1296 = vmatpush3.msra.mxu1 %v769_v60  ;;  %v1000_v60 = vld [vmem:[#allocation5 + $0xa8] sm:$0xff] }
 0x3c8   :  { %1297 = vmatprep.subr.mxu1 %v768_v6 }
 0x3c9   :  { %1298 = vmatpush3.msra.mxu1 %v768_v6 }
 0x3ca   :  { %1299 = vmatprep.subr.mxu1 %v767_v7 }
 0x3cb   :  { %1300 = vmatpush3.msra.mxu1 %v767_v7 }
 0x3cc   :  { %1301 = vmatprep.subr.mxu1 %v766_v8 }
 0x3cd   :  { %1302 = vmatpush3.msra.mxu1 %v766_v8 }
 0x3ce   :  { %1303 = vmatprep.subr.mxu1 %v765_v9 }
 0x3cf   :  { %1304 = vmatpush3.msra.mxu1 %v765_v9 }
 0x480   :  { %v1277_v14 = vpop.f32.mrf.mxu1 }
 0x481   :  { %v587_v15 = vadd.f32 %v1277_v14, %v1125_v13 }
 0x482   :  { %v581_v16 = vpop.f32.mrf.mxu1 }
 0x483   :  { %v582_v18 = vadd.f32 %v1125_v13, %v581_v16  ;;  %594 = vrot.lane.b32.xlu1 %v587_v15, %s1427_s1 }
 0x485   :  { %592 = vrot.lane.b32.xlu0 %v582_v18, %s1427_s1  ;;  %v1133_v18 = vld [vmem:[#allocation5 + $0x10d] ss:$0 sm:$0xff] }
 0x4f5   :  { %v595_v19 = vpop.permute.xlu1 %594 }
 0x4f6   :  { %v1570_v21 = vadd.f32 %v595_v19, %v1487_v17 }
 0x4f7   :  { %v593_v22 = vpop.permute.xlu0 %592 }
 0x4f8   :  { %v598_v23 = vadd.f32 %v593_v22, %v1489_v20  ;;  %604 = vrot.lane.b32.xlu1 %v1570_v21, %s1426_s0  ;;  %v618_v24 = vmul.f32 %v1570_v21, %v1570_v21 }
 0x4fa   :  { %602 = vrot.lane.b32.xlu0 %v598_v23, %s1426_s0  ;;  %v617_v25 = vmul.f32 %v598_v23, %v598_v23 }
 0x4fc   :  { %623 = vrot.lane.b32.xlu1 %v618_v24, %s1426_s0 }
 0x4fe   :  { %621 = vrot.lane.b32.xlu0 %v617_v25, %s1426_s0 }
 0x56a   :  { %v605_v26 = vpop.permute.xlu1 %604 }
 0x56b   :  { %v611_v17 = vsel %vm205_vm1, %v605_v26, 0.0 }
 0x56c   :  { %612 = vadd.xlane.f32.xlu1 %v611_v17  ;;  %v603_v27 = vpop.permute.xlu0 %602 }
 0x56d   :  { %v608_v20 = vsel %vm205_vm1, %v603_v27, 0.0 }
 0x56e   :  { %609 = vadd.xlane.f32.xlu0 %v608_v20  ;;  %v624_v30 = vpop.permute.xlu1 %623 }
 0x56f   :  { %v630_v31 = vsel %vm205_vm1, %v624_v30, 0.0 }
 0x570   :  { %v622_v28 = vpop.permute.xlu0 %621 }
 0x571   :  { %v627_v29 = vsel %vm205_vm1, %v622_v28, 0.0 }
 0x572   :  { %628 = vadd.xlane.f32.xlu0 %v627_v29 }
 0x576   :  { %631 = vadd.xlane.f32.xlu0 %v630_v31 }
 0x57d   :  { %654 = vrot.lane.b32.xlu1 %v1128_v32, %s1427_s1 }
 0x58c   :  { %664 = vrot.lane.b32.xlu0 %v1129_v33, %s1427_s1 }
 0x5f5   :  { %v613_v38 = vpop.xlane.xlu1 %612 }
 0x5f6   :  { %v616_v40 = vmul.f32 0.03125, %v613_v38 }
 0x5f7   :  { %v610_v36 = vpop.xlane.xlu0 %609 }
 0x5f8   :  { %v615_v37 = vmul.f32 0.03125, %v610_v36  ;;  %v636_v45 = vmul.f32 %v616_v40, %v616_v40  ;;  %v642_v61 = vsub.f32 %v1570_v21, %v616_v40  ;;  %v1429_v36 = vmov 0.0  }
 0x5f9   :  { %v655_v56 = vpop.permute.xlu1 %654  ;;  %1308 = vmatprep.subr.mxu0 %v1429_v36 }
 0x5fa   :  { %v635_v41 = vmul.f32 %v615_v37, %v615_v37  ;;  %v641_v54 = vsub.f32 %v598_v23, %v615_v37 }
 0x5fb   :  { %v629_v39 = vpop.xlane.xlu0 %628 }
 0x5fc   :  { %v633_v42 = vmul.f32 0.03125, %v629_v39 }
 0x5fe   :  { %v637_v43 = vsub.f32 %v633_v42, %v635_v41 }
 0x5ff   :  { %v632_v44 = vpop.xlane.xlu0 %631 }
 0x600   :  { %v643_v46 = vadd.f32 1e-05, %v637_v43  ;;  %v634_v47 = vmul.f32 0.03125, %v632_v44 }
 0x602   :  { %1344 = vrsqrt.f32 %v643_v46  ;;  %v638_v48 = vsub.f32 %v634_v47, %v636_v45 }
 0x603   :  { %v665_v59 = vpop.permute.xlu0 %664 }
 0x604   :  { %v644_v49 = vadd.f32 1e-05, %v638_v48 }
 0x606   :  { %1346 = vrsqrt.f32 %v644_v49 }
 0x60f   :  { %v1345_v55 = vpop.eup %1344 }
 0x610   :  { %v647_v58 = vmul.f32 %v1345_v55, %v641_v54 }
 0x612   :  { %v657_v62 = vmul.f32 %v655_v56, %v647_v58  ;;  %v915_v58 = vld [vmem:[#allocation5 + $0x100] sm:$0x3] }
 0x613   :  { %v1347_v63 = vpop.eup %1346 }
 0x614   :  { %v648_v0 = vmul.f32 %v1347_v63, %v642_v61  ;;  %v667_v1 = vadd.f32 %v665_v59, %v657_v62  ;;  %v999_v61 = vld [vmem:[#allocation5 + $0xa0] sm:$0xff]  ;;  %v998_v62 = vld [vmem:[#allocation5 + $0x98] sm:$0xff]  ;;  %v997_v63 = vld [vmem:[#allocation5 + $0x90] sm:$0xff] }
 0x616   :  { %v658_v2 = vmul.f32 %v655_v56, %v648_v0  ;;  %680 = vrot.lane.b32.xlu1 %v667_v1, %s1426_s0 }
 0x618   :  { %v668_v3 = vadd.f32 %v665_v59, %v658_v2  ;;  %v1137_v2 = vld [vmem:[#allocation5 + $0x10e] ss:$0 sm:$0xff] }
 0x61a   :  { %682 = vrot.lane.b32.xlu1 %v668_v3, %s1426_s0 }
 0x688   :  { %v681_v4 = vpop.permute.xlu1 %680 }
 0x689   :  { %1286 = vmatprep.mubr.msk.f32.mxu0 %vm205_vm1, %v681_v4 }
 0x68c   :  { %v683_v5 = vpop.permute.xlu1 %682 }
 0x68d   :  { %1287 = vmatmul.mubr.msk.f32.vlgmr.msra.gmra.mxu0 %vm205_vm1, %v683_v5 }
 0x68e   :  { %1312 = vmatprep.mubr.msk.f32.mxu0 %vm1430_vm3, %v1429_v36 }
 0x74d   :  { %v1288_v11 = vpop.f32.mrf.mxu0 }
 0x74e   :  { %v760_v12 = vadd.f32 %v1288_v11, %v1130_v10 }
 0x74f   :  { %v754_v13 = vpop.f32.mrf.mxu0 }
 0x750   :  { %v755_v14 = vadd.f32 %v1130_v10, %v754_v13  ;;  %v764_v16 = vmax.f32 %v760_v12, 0.0 }
 0x752   :  { %v763_v15 = vmax.f32 %v755_v14, 0.0 }
 0x754   :  { %1305 = vmatprep.mubr.msk.f32.mxu1 %vm303_vm2, %v763_v15 }
 0x755   :  { %1306 = vmatmul.mubr.msk.f32.vlgmr.msra.gmra.mxu1 %vm303_vm2, %v764_v16 }
 0x815   :  { %v1307_v19 = vpop.f32.mrf.mxu1 }
 0x816   :  { %v856_v21 = vadd.f32 %v1307_v19, %v1133_v18 }
 0x817   :  { %v850_v22 = vpop.f32.mrf.mxu1 }
 0x818   :  { %v851_v23 = vadd.f32 %v1133_v18, %v850_v22  ;;  %863 = vrot.lane.b32.xlu0 %v856_v21, %s1427_s1 }
 0x81a   :  { %861 = vrot.lane.b32.xlu1 %v851_v23, %s1427_s1 }
 0x88a   :  { %v864_v24 = vpop.permute.xlu0 %863 }
 0x88b   :  { %v868_v25 = vadd.f32 %v864_v24, %v668_v3 }
 0x88c   :  { %v862_v26 = vpop.permute.xlu1 %861 }
 0x88d   :  { %v867_v17 = vadd.f32 %v862_v26, %v667_v1  ;;  %873 = vrot.lane.b32.xlu0 %v868_v25, %s1426_s0  ;;  %v886_v27 = vmul.f32 %v868_v25, %v868_v25 }
 0x88f   :  { %871 = vrot.lane.b32.xlu1 %v867_v17, %s1426_s0  ;;  %v885_v20 = vmul.f32 %v867_v17, %v867_v17 }
 0x891   :  { %891 = vrot.lane.b32.xlu0 %v886_v27, %s1426_s0 }
 0x893   :  { %889 = vrot.lane.b32.xlu1 %v885_v20, %s1426_s0 }
 0x8ff   :  { %v874_v28 = vpop.permute.xlu0 %873 }
 0x900   :  { %v880_v29 = vsel %vm205_vm1, %v874_v28, 0.0 }
 0x901   :  { %881 = vadd.xlane.f32.xlu0 %v880_v29  ;;  %v872_v30 = vpop.permute.xlu1 %871 }
 0x902   :  { %v877_v31 = vsel %vm205_vm1, %v872_v30, 0.0 }
 0x903   :  { %v892_v32 = vpop.permute.xlu0 %891  ;;  %878 = vadd.xlane.f32.xlu1 %v877_v31 }
 0x904   :  { %v898_v33 = vsel %vm205_vm1, %v892_v32, 0.0 }
 0x905   :  { %899 = vadd.xlane.f32.xlu0 %v898_v33  ;;  %v890_v34 = vpop.permute.xlu1 %889 }
 0x906   :  { %v895_v35 = vsel %vm205_vm1, %v890_v34, 0.0 }
 0x909   :  { %896 = vadd.xlane.f32.xlu0 %v895_v35 }
 0x98a   :  { %v882_v37 = vpop.xlane.xlu0 %881 }
 0x98b   :  { %v884_v38 = vmul.f32 0.03125, %v882_v37 }
 0x98c   :  { %v879_v39 = vpop.xlane.xlu1 %878 }
 0x98d   :  { %v904_v41 = vmul.f32 %v884_v38, %v884_v38  ;;  %v883_v42 = vmul.f32 0.03125, %v879_v39  ;;  %v908_v51 = vsub.f32 %v868_v25, %v884_v38 }
 0x98e   :  { %v900_v40 = vpop.xlane.xlu0 %899 }
 0x98f   :  { %v902_v43 = vmul.f32 0.03125, %v900_v40  ;;  %v903_v46 = vmul.f32 %v883_v42, %v883_v42  ;;  %v907_v54 = vsub.f32 %v867_v17, %v883_v42 }
 0x991   :  { %v906_v44 = vsub.f32 %v902_v43, %v904_v41 }
 0x992   :  { %v897_v45 = vpop.xlane.xlu0 %896 }
 0x993   :  { %v910_v47 = vadd.f32 1e-05, %v906_v44  ;;  %v901_v48 = vmul.f32 0.03125, %v897_v45 }
 0x995   :  { %1348 = vrsqrt.f32 %v910_v47  ;;  %v905_v49 = vsub.f32 %v901_v48, %v903_v46 }
 0x997   :  { %v909_v50 = vadd.f32 1e-05, %v905_v49 }
 0x999   :  { %1350 = vrsqrt.f32 %v909_v50 }
 0x9a2   :  { %v1349_v52 = vpop.eup %1348 }
 0x9a3   :  { %v914_v53 = vmul.f32 %v1349_v52, %v908_v51 }
 0x9a5   :  { %920 = vrot.lane.b32.xlu1 %v914_v53, %s1426_s0 }
 0x9a6   :  { %v1351_v55 = vpop.eup %1350 }
 0x9a7   :  { %v913_v56 = vmul.f32 %v1351_v55, %v907_v54 }
 0x9a9   :  { %918 = vrot.lane.b32.xlu0 %v913_v56, %s1426_s0 }
 0xa17   :  { %v921_v57 = vpop.permute.xlu1 %920 }
 0xa18   :  { %1309 = vmatpush3.msra.mxu0 %v921_v57 }
 0xa19   :  { %1310 = vmatprep.subr.mxu0 %v1429_v36 }
 0xa1b   :  { %v919_v59 = vpop.permute.xlu0 %918 }
 0xa1c   :  { %1311 = vmatpush3.msra.mxu0 %v919_v59 }
 0xa1d   :  { %1313 = vmatmul.mubr.msk.f32.vlgmr.msra.gmra.mxu0 %vm49_vm0, %v915_v58  ;;  %1315 = vmatprep.subr.mxu0 %v1429_v36 }
 0xa1e   :  { %1316 = vmatpush3.msra.mxu0 %v1000_v60  ;;  %1323 = vmatprep.mubr.msk.f32.mxu0 %vm1430_vm3, %v1429_v36 }
 0xa1f   :  { %1317 = vmatprep.subr.mxu0 %v1429_v36 }
 0xa20   :  { %1318 = vmatpush3.msra.mxu0 %v999_v61 }
 0xa21   :  { %1319 = vmatprep.subr.mxu0 %v1429_v36 }
 0xa22   :  { %1320 = vmatpush3.msra.mxu0 %v998_v62 }
 0xa23   :  { %1321 = vmatprep.subr.mxu0 %v1429_v36 }
 0xa24   :  { %1322 = vmatpush3.msra.mxu0 %v997_v63 }
 0xadd   :  { %v993_v0 = vpop.f32.mrf.mxu0 }
 0xade   :  { %1324 = vmatmul.mubr.msk.f32.vlgmr.msra.gmra.mxu0 %vm205_vm1, %v993_v0 }
 0xadf   :  { %v1314_v1 = vpop.f32.mrf.mxu0 }
 0xb9e   :  { %v1075_v3 = vpop.f32.mrf.mxu0 }
 0xb9f   :  { %v1076_v4 = vadd.f32 %v1137_v2, %v1075_v3 }
 0xba0   :  { %v1325_v5 = vpop.f32.mrf.mxu0 }
 0xba1   :  { %v1080_v6 = vsel %vm1079_vm4, %v1076_v4, -inf }
 0xba2   :  { %1081 = vmax.xlane.f32.xlu1 %v1080_v6 }
 0xc2b   :  { %v1082_v7 = vpop.xlane.xlu1 %1081 }
 0xc2c   :  { %v1083_v8 = vsub.f32 %v1076_v4, %v1082_v7 }
 0xc2e   :  { %v1084_v9 = vmul.f32 1.442695, %v1083_v8 }
 0xc30   :  { %1352 = vpow2.f32 %v1084_v9 }
 0xc3d   :  { %v1353_v10 = vpop.eup %1352 }
 0xc3e   :  { %v1086_v11 = vsel %vm1079_vm4, %v1353_v10, 0.0 }
 0xc3f   :  { %1087 = vadd.xlane.f32.xlu0 %v1086_v11 }
 0xcc8   :  { %v1088_v12 = vpop.xlane.xlu0 %1087 }
 0xcc9   :  { %1354 = vrcp.f32 %v1088_v12 }
 0xcd6   :  { %v1355_v13 = vpop.eup %1354 }
 0xcd7   :  { %v1090_v14 = vmul.f32 %v1355_v13, %v1353_v10 }
 0xcd9   :  { %1091 = vst.msk [vmem:[#allocation7] sm:$0x3] %vm1079_vm4, %v1090_v14 }
 0xcda   :  { %1407 = shalt.err (!%p1404_p0)
}
 0xcdb   :  { %1101 = dma.vmem_to_hbm [thread:$0]  %s1099_s23, 32, %s1617_s2, [#allocation4]  }
 0xcdc   :  { %1420 = dma.done.wait [#allocation4], 32  }
 0xcdd   :  { %1421 = vsyncadd [#allocation4], 4294967264 }
 0xcde   :  { %1105 = vsyncpa [#allocation3], 1 }
 0xcdf   :  { %1106 = vsyncpa [#allocation6], 1 }
 0xce0   :  { %1107 = vsyncpa [#allocation4], 1 }

</bundles_post_ra>
